<compile_context>
chip_gen: v7x
topology: tpu7x:2x2x1
jax: 0.10.0
libtpu: 0.0.40
codegen_flags: <defaults>
</compile_context>

<pallas_src>
import jax
import jax.numpy as jnp
from jax.experimental import pallas as pl
from jax.experimental.pallas import tpu as pltpu

HIDDEN = 128        # fixed by the module spec: nn.Linear(input_dim, 128)
LANE = 128
SUBLANE = 8
NEG_INF_BIAS = -1e30  # padded output lanes: exp(-1e30 - m) == 0, no softmax corruption


def _round_up(x, m):
    return ((x + m - 1) // m) * m


def opponent_model_kernel(x_ref, w1_ref, b1_ref, w2_ref, b2_ref, o_ref):
    # ---- Linear 1: bf16 MXU matmul, f32 accumulate; bias + ReLU in f32 (VPU) ----
    h = jnp.dot(x_ref[...], w1_ref[...], preferred_element_type=jnp.float32)
    h = jnp.maximum(h + b1_ref[...], 0.0)

    # ---- Linear 2: output lanes padded to 128 -> lane-dense stores/softmax ----
    logits = jnp.dot(h.astype(w2_ref.dtype), w2_ref[...],
                     preferred_element_type=jnp.float32)
    logits = logits + b2_ref[...]            # padded lanes carry -1e30

    # ---- Numerically stable softmax over the (padded) last dim ----
    m = jnp.max(logits, axis=-1, keepdims=True)
    e = jnp.exp(logits - m)                  # padded lanes -> exactly 0
    denom = jnp.sum(e, axis=-1, keepdims=True)   # >= 1 (max lane contributes exp(0)=1)
    # Exact f32 divide: preserves the Softmax sum-to-1 invariant (approx reciprocal
    # was ~1e-3 off, which is visible in sum(probs)).
    o_ref[...] = e / denom


def prepare_params(w1, b1, w2, b2):
    """One-time (outside the hot path) padding / bf16 casting of the weights.

    Weights are stored pre-transposed as (in_features, out_features):
      w1: (input_dim, 128), b1: (128,), w2: (128, output_dim), b2: (output_dim,)
    """
    d_in, d_hidden = w1.shape
    d_out = w2.shape[1]
    assert d_hidden == HIDDEN and w2.shape[0] == HIDDEN

    d_in_p = _round_up(d_in, LANE)
    d_out_p = _round_up(d_out, LANE)

    w1_p = jnp.zeros((d_in_p, HIDDEN), jnp.float32).at[:d_in, :].set(w1)
    w2_p = jnp.zeros((HIDDEN, d_out_p), jnp.float32).at[:, :d_out].set(w2)
    b2_p = jnp.full((1, d_out_p), NEG_INF_BIAS, jnp.float32).at[0, :d_out].set(b2)

    return dict(
        w1=w1_p.astype(jnp.bfloat16),                    # bf16 MXU inputs, half DMA bytes
        b1=b1.reshape(1, HIDDEN).astype(jnp.float32),    # bias/ReLU stay f32
        w2=w2_p.astype(jnp.bfloat16),
        b2=b2_p,
        d_in=d_in, d_in_p=d_in_p, d_out=d_out, d_out_p=d_out_p,
    )


def opponent_model_forward(state, params, *, block_batch=512):
    """state: (B, input_dim) f32. Returns softmax probs (B, output_dim) f32."""
    B, d_in = state.shape
    assert d_in == params["d_in"]
    d_in_p, d_out, d_out_p = params["d_in_p"], params["d_out"], params["d_out_p"]

    # Batch tile: multiple of 8 sublanes, at most block_batch.
    tb = _round_up(min(block_batch, _round_up(B, SUBLANE)), SUBLANE)
    b_pad = _round_up(B, tb)

    # Pad batch + feature dims and cast activations to bf16 for the MXU.
    x = jnp.pad(state.astype(jnp.bfloat16),
                ((0, b_pad - B), (0, d_in_p - d_in)))

    grid = (b_pad // tb,)
    out = pl.pallas_call(
        opponent_model_kernel,
        out_shape=jax.ShapeDtypeStruct((b_pad, d_out_p), jnp.float32),
        grid_spec=pltpu.PrefetchScalarGridSpec(
            num_scalar_prefetch=0,
            grid=grid,
            in_specs=[
                # activations: tiled on batch, pipelined/double-buffered
                pl.BlockSpec((tb, d_in_p), lambda i: (i, 0)),
                # weights/biases: constant block index -> stay VMEM-resident
                pl.BlockSpec((d_in_p, HIDDEN), lambda i: (0, 0)),
                pl.BlockSpec((1, HIDDEN), lambda i: (0, 0)),
                pl.BlockSpec((HIDDEN, d_out_p), lambda i: (0, 0)),
                pl.BlockSpec((1, d_out_p), lambda i: (0, 0)),
            ],
            out_specs=pl.BlockSpec((tb, d_out_p), lambda i: (i, 0)),
        ),
        compiler_params=pltpu.CompilerParams(
            # independent batch tiles -> megacore sharding on v7x (harmless elsewhere)
            dimension_semantics=("parallel",),
        ),
    )(x, params["w1"], params["b1"], params["w2"], params["b2"])

    # Strip batch padding and the lane padding of the output.
    return out[:B, :d_out]


def init_params(key, input_dim, hidden_dim, output_dim):
    """Deterministic init mimicking nn.Linear defaults (uniform(-1/sqrt(fan_in), +))."""
    k1, k2, k3, k4 = jax.random.split(key, 4)
    bound1 = 1.0 / jnp.sqrt(input_dim)
    bound2 = 1.0 / jnp.sqrt(hidden_dim)
    # stored pre-transposed: (in, out)
    w1 = jax.random.uniform(k1, (input_dim, hidden_dim), jnp.float32, -bound1, bound1)
    b1 = jax.random.uniform(k2, (hidden_dim,), jnp.float32, -bound1, bound1)
    w2 = jax.random.uniform(k3, (hidden_dim, output_dim), jnp.float32, -bound2, bound2)
    b2 = jax.random.uniform(k4, (output_dim,), jnp.float32, -bound2, bound2)
    return w1, b1, w2, b2


if __name__ == "__main__":
    key = jax.random.PRNGKey(0)
    k_params, k_state = jax.random.split(key)

    batch = 16
    input_dim = 32
    output_dim = 16

    w1, b1, w2, b2 = init_params(k_params, input_dim, HIDDEN, output_dim)
    state = jax.random.normal(k_state, (batch, input_dim), jnp.float32)

    params = prepare_params(w1, b1, w2, b2)
    # block_batch=8 exercises a multi-step, pipelined batch grid even at tiny B.
    probs = opponent_model_forward(state, params, block_batch=8)
    probs = jax.block_until_ready(probs)

    # Pure-JAX f32 reference.
    h_ref = jnp.maximum(state @ w1 + b1, 0.0)
    probs_ref = jax.nn.softmax(h_ref @ w2 + b2, axis=-1)

    assert probs.shape == (batch, output_dim)
    # Tolerance accounts for bf16 MXU inputs on the two matmuls.
    assert jnp.allclose(probs, probs_ref, atol=2e-3), "mismatch vs reference"
    # Exact divide in the kernel -> rows sum to 1 to f32 rounding.
    assert jnp.allclose(jnp.sum(probs, axis=-1), 1.0, atol=1e-3)

    print("KERNEL_OK")
</pallas_src>

<mosaic_0001>
module attributes {stable_mosaic.version = 11 : i64} {
  func.func @opponent_model_kernel(%arg0: i32, %arg1: memref<8x128xbf16, #tpu.memory_space<vmem>>, %arg2: memref<128x128xbf16, #tpu.memory_space<vmem>>, %arg3: memref<1x128xf32, #tpu.memory_space<vmem>>, %arg4: memref<128x128xbf16, #tpu.memory_space<vmem>>, %arg5: memref<1x128xf32, #tpu.memory_space<vmem>>, %arg6: memref<8x128xf32, #tpu.memory_space<vmem>>) attributes {dimension_semantics = [#tpu.dimension_semantics<parallel>], iteration_bounds = array<i64: 2>, scalar_prefetch = 0 : i64, scratch_operands = 0 : i64, tpu.core_type = #tpu.core_type<tc>, window_params = [{transform_indices = @transform_0, window_bounds = array<i64: 8, 128>}, {pipeline_mode = #tpu.pipeline_mode<synchronous>, transform_indices = @transform_1, window_bounds = array<i64: 128, 128>}, {pipeline_mode = #tpu.pipeline_mode<synchronous>, transform_indices = @transform_2, window_bounds = array<i64: 1, 128>}, {pipeline_mode = #tpu.pipeline_mode<synchronous>, transform_indices = @transform_3, window_bounds = array<i64: 128, 128>}, {pipeline_mode = #tpu.pipeline_mode<synchronous>, transform_indices = @transform_4, window_bounds = array<i64: 1, 128>}, {transform_indices = @transform_5, window_bounds = array<i64: 8, 128>}]} {
    %c0 = arith.constant 0 : index
    %c0_0 = arith.constant 0 : index
    %0 = vector.load %arg1[%c0, %c0_0] : memref<8x128xbf16, #tpu.memory_space<vmem>>, vector<8x128xbf16>
    %c0_1 = arith.constant 0 : index
    %c0_2 = arith.constant 0 : index
    %1 = vector.load %arg2[%c0_1, %c0_2] : memref<128x128xbf16, #tpu.memory_space<vmem>>, vector<128x128xbf16>
    %cst = arith.constant dense<0.000000e+00> : vector<8x128xf32>
    %2 = tpu.matmul %0, %1, %cst {dimension_numbers = #tpu.dot_dimension_numbers<[1], [0], [0], [1], [0, 0, 1, 1], [], []>} : vector<8x128xbf16>, vector<128x128xbf16>, vector<8x128xf32> -> vector<8x128xf32>
    %c0_3 = arith.constant 0 : index
    %c0_4 = arith.constant 0 : index
    %3 = vector.load %arg3[%c0_3, %c0_4] : memref<1x128xf32, #tpu.memory_space<vmem>>, vector<1x128xf32>
    %4 = vector.broadcast %3 : vector<1x128xf32> to vector<8x128xf32>
    %5 = arith.addf %2, %4 : vector<8x128xf32>
    %cst_5 = arith.constant 0.000000e+00 : f32
    %6 = vector.broadcast %cst_5 : f32 to vector<8x128xf32>
    %7 = arith.maximumf %5, %6 : vector<8x128xf32>
    %8 = arith.truncf %7 : vector<8x128xf32> to vector<8x128xbf16>
    %c0_6 = arith.constant 0 : index
    %c0_7 = arith.constant 0 : index
    %9 = vector.load %arg4[%c0_6, %c0_7] : memref<128x128xbf16, #tpu.memory_space<vmem>>, vector<128x128xbf16>
    %cst_8 = arith.constant dense<0.000000e+00> : vector<8x128xf32>
    %10 = tpu.matmul %8, %9, %cst_8 {dimension_numbers = #tpu.dot_dimension_numbers<[1], [0], [0], [1], [0, 0, 1, 1], [], []>} : vector<8x128xbf16>, vector<128x128xbf16>, vector<8x128xf32> -> vector<8x128xf32>
    %c0_9 = arith.constant 0 : index
    %c0_10 = arith.constant 0 : index
    %11 = vector.load %arg5[%c0_9, %c0_10] : memref<1x128xf32, #tpu.memory_space<vmem>>, vector<1x128xf32>
    %12 = vector.broadcast %11 : vector<1x128xf32> to vector<8x128xf32>
    %13 = arith.addf %10, %12 : vector<8x128xf32>
    %cst_11 = arith.constant dense<0xFF800000> : vector<8xf32>
    %14 = vector.multi_reduction <maximumf>, %13, %cst_11 [1] : vector<8x128xf32> to vector<8xf32>
    %15 = vector.shape_cast %14 : vector<8xf32> to vector<8x1xf32>
    %16 = vector.broadcast %15 : vector<8x1xf32> to vector<8x128xf32>
    %17 = arith.subf %13, %16 : vector<8x128xf32>
    %18 = math.exp %17 : vector<8x128xf32>
    %cst_12 = arith.constant dense<0.000000e+00> : vector<8xf32>
    %19 = vector.multi_reduction <add>, %18, %cst_12 [1] : vector<8x128xf32> to vector<8xf32>
    %20 = vector.shape_cast %19 : vector<8xf32> to vector<8x1xf32>
    %21 = vector.broadcast %20 : vector<8x1xf32> to vector<8x128xf32>
    %22 = arith.divf %18, %21 : vector<8x128xf32>
    %c0_13 = arith.constant 0 : index
    %c0_14 = arith.constant 0 : index
    %23 = vector.load %arg6[%c0_13, %c0_14] : memref<8x128xf32, #tpu.memory_space<vmem>>, vector<8x128xf32>
    tpu.vector_store %arg6[%c0_13, %c0_14], %22 {strides = array<i32>} : memref<8x128xf32, #tpu.memory_space<vmem>>, vector<8x128xf32>,
    return
  }
  func.func @transform_0(%arg0: i32) -> (i32, i32) {
    %c0_i32 = arith.constant 0 : i32
    %c0_i32_0 = arith.constant 0 : i32
    return %arg0, %c0_i32 : i32, i32
  }
  func.func @transform_1(%arg0: i32) -> (i32, i32) {
    %c0_i32 = arith.constant 0 : i32
    %c0_i32_0 = arith.constant 0 : i32
    %c0_i32_1 = arith.constant 0 : i32
    return %c0_i32, %c0_i32_0 : i32, i32
  }
  func.func @transform_2(%arg0: i32) -> (i32, i32) {
    %c0_i32 = arith.constant 0 : i32
    %c0_i32_0 = arith.constant 0 : i32
    %c0_i32_1 = arith.constant 0 : i32
    return %c0_i32, %c0_i32_0 : i32, i32
  }
  func.func @transform_3(%arg0: i32) -> (i32, i32) {
    %c0_i32 = arith.constant 0 : i32
    %c0_i32_0 = arith.constant 0 : i32
    %c0_i32_1 = arith.constant 0 : i32
    return %c0_i32, %c0_i32_0 : i32, i32
  }
  func.func @transform_4(%arg0: i32) -> (i32, i32) {
    %c0_i32 = arith.constant 0 : i32
    %c0_i32_0 = arith.constant 0 : i32
    %c0_i32_1 = arith.constant 0 : i32
    return %c0_i32, %c0_i32_0 : i32, i32
  }
  func.func @transform_5(%arg0: i32) -> (i32, i32) {
    %c0_i32 = arith.constant 0 : i32
    %c0_i32_0 = arith.constant 0 : i32
    return %arg0, %c0_i32 : i32, i32
  }
}

</mosaic_0001>

<bundles_post_ra>
// kernel: tpu_custom_call.1
= control target key start
LH: loop header
LB: loop body
LE: loop exit
PB: predicated region body
PF: predicated region fallthrough
CT: control target
= control target key end

     0   :  { %10 = vsyncpa [#allocation3], 0  ;;  %s1226_s0 = inlined_call_operand.hbm [shape: bf16[16,128], index: 0, kind: input, shape index: {}]   ;;  %s1227_s1 = inlined_call_operand.hbm [shape: bf16[128,128], index: 1, kind: input, shape index: {}]   ;;  %s1228_s2 = inlined_call_operand.vmem [shape: f32[1,128], index: 2, kind: input, shape index: {}]   ;;  %s1229_s3 = inlined_call_operand.hbm [shape: bf16[128,128], index: 3, kind: input, shape index: {}]   ;;  %s1230_s4 = inlined_call_operand.vmem [shape: f32[1,128], index: 4, kind: input, shape index: {}]   ;;  %s1231_s5 = inlined_call_operand.hbm [shape: f32[16,128], index: 5, kind: output, shape index: {}]  }
   0x1   :  { %12 = vsyncpa [#allocation3 + $0x1], 0 }
   0x2   :  { %13 = vsyncpa [#allocation6], 0 }
   0x3   :  { %14 = vsyncpa [#allocation4], 0 }
   0x4   :  { %16 = vsyncpa [#allocation4 + $0x1], 0  ;;  %s987_s18 = smov 0   ;;  %s989_s19 = smov 0  }
   0x5   :  { %s991_s20 = smov 0   ;;  %s993_s21 = smov 0  }
   0x6 LB: > { %s1008_s22 = sadd.s32 4294967295, %s947_s21   ;;  %s608_s23 = sadd.s32 4294967294, %s947_s21   ;;  %s947_s21 = sphi %s993_s21, %s1251_s21   ;;  %s943_s20 = sphi %s991_s20, %s1250_s20   ;;  %s939_s19 = sphi %s989_s19, %s1249_s19   ;;  %s935_s18 = sphi %s987_s18, %s1248_s18  }
   0x7   : > { %p42_p0 = scmp.ne.s32.totalorder %s939_s19, %s935_s18  ;;  %p1232_p1 = scmp.eq.s32.totalorder %s1008_s22, 0 }
   0x8   : > { %p156_p3 = scmp.eq.s32.totalorder %s608_s23, 1  ;;  %p609_p5 = scmp.ge.s32.totalorder %s947_s21, 1 }
   0x9   : > { %p1017_p4 = por %p1232_p1, %p42_p0  ;;  %p163_p7 = scmp.lt.s32.totalorder %s947_s21, 3 }
   0xa   : > { %p1022_p6 = por %p156_p3, %p42_p0  ;;  %s949_s27 = smov [#allocation5]  }
   0xb   : > { %s1235_s24 = scalar_select %p1017_p4, 1, 0 }
   0xc   : > { %s1236_s25 = scalar_select %p1022_p6, 1, 0 }
   0xd   : > { %p1027_p8 = pnand %p609_p5, %p163_p7  ;;  %s175_s28 = sshll.u32 %s949_s27, 4  ;;  %s1031_s28 = int_to_ptr.vmem [resolvable:$true] %s175_s28 }
   0xe   : > { %s950_s30 = smov [#allocation7]   ;;  %s791_s9 = scalar_lea.hbm %s1227_s1, 1024 }
   0xf   : > { %p712_p9 = pneg %p1027_p8  ;;  %s191_s6 = sshll.u32 %s950_s30, 4  ;;  %s1042_s6 = int_to_ptr.vmem [resolvable:$true] %s191_s6 }
  0x10   : > { %p792_p12 = scmp.ne.s32.totalorder %s1227_s1, %s791_s9  ;;  %p798_p5 = scmp.lt.u32.totalorder %s791_s9, %s1227_s1 }
  0x11   : > { %p1038_p11 = pnand %p712_p9, %p1232_p1 }
  0x13   : > { %p793_p13 = pneg %p1038_p11 }
  0x15   : > { %p794_p0 = pnand %p793_p13, %p792_p12 }
  0x17   : > { %p795_p3 = pneg %p794_p0 }
  0x19   : > { %p800_p7 = pnand %p798_p5, %p795_p3 }
  0x1b   : > { %803 = shalt.err (!%p800_p7)
}
  0x1c   : > { %s804_s14 = scalar_lea.vmem %s1031_s28, 1024  ;;  %p812_p2 = scmp.lt.s32.totalorder %s1031_s28, %s1031_s28 }
  0x1d   : > { %p805_p9 = scmp.ne.s32.totalorder %s1031_s28, %s804_s14  ;;  %p813_p12 = scmp.lt.s32.totalorder %s804_s14, %s804_s14 }
  0x1f   : > { %p807_p10 = pnand %p805_p9, %p793_p13  ;;  %p814_p0 = por %p813_p12, %p812_p2 }
  0x21   : > { %p808_p1 = pneg %p807_p10 }
  0x23   : > { %p815_p6 = pnand %p814_p0, %p808_p1 }
  0x25   : > { %818 = shalt.err (!%p815_p6)
}
  0x26   : > { %s951_s15 = smov 64   ;;  %s952_s16 = smov 4  }
  0x27   : > { %715 = dma.hbm_to_vmem [thread:$0]  (!%p1038_p11), %s1227_s1, 1024, %s1031_s28, [#allocation6], %s951_s15, %s951_s15, %s952_s16  }
  0x28   : > { %s819_s7 = scalar_lea.hbm %s1229_s3, 1024 }
  0x29   : > { %p820_p2 = scmp.ne.s32.totalorder %s1229_s3, %s819_s7  ;;  %p826_p10 = scmp.lt.u32.totalorder %s819_s7, %s1229_s3 }
  0x2b   : > { %p822_p1 = pnand %p820_p2, %p793_p13 }
  0x2d   : > { %p823_p6 = pneg %p822_p1 }
  0x2f   : > { %p828_p3 = pnand %p826_p10, %p823_p6 }
  0x31   : > { %831 = shalt.err (!%p828_p3)
}
  0x32   : > { %s832_s28 = scalar_lea.vmem %s1042_s6, 1024  ;;  %p840_p12 = scmp.lt.s32.totalorder %s1042_s6, %s1042_s6 }
  0x33   : > { %p833_p5 = scmp.ne.s32.totalorder %s1042_s6, %s832_s28  ;;  %p841_p0 = scmp.lt.s32.totalorder %s832_s28, %s832_s28 }
  0x35   : > { %p835_p7 = pnand %p833_p5, %p793_p13  ;;  %p842_p2 = por %p841_p0, %p840_p12 }
  0x37   : > { %p836_p9 = pneg %p835_p7 }
  0x39   : > { %p843_p1 = pnand %p842_p2, %p836_p9 }
  0x3b   : > { %846 = shalt.err (!%p843_p1)
}
  0x3c   : > { %718 = dma.hbm_to_vmem [thread:$0]  (!%p1038_p11), %s1229_s3, 1024, %s1042_s6, [#allocation6], %s951_s15, %s951_s15, %s952_s16  }
  0x3d   : > { %s1097_s14 = sadd.s32 1, %s947_s21   ;;  %s29_s29 = sadd.s32 1, %s943_s20 }
  0x3e   : > { %s26_s17 = ssub.s32 %s947_s21, %s1097_s14  ;;  %p36_p13 = scmp.ne.s32.totalorder %s943_s20, %s939_s19 }
  0x3f   : > { %p27_p6 = scmp.eq.s32.totalorder %s26_s17, 0  ;;  %p37_p10 = scmp.eq.s32.totalorder %s947_s21, 0 }
  0x40   : > { %p1239_p3 = scmp.eq.s32.totalorder %s1008_s22, 1  ;;  %p729_p7 = scmp.lt.s32.totalorder %s947_s21, 2 }
  0x41   : > { %s1113_s27 = scalar_select %p27_p6, %s943_s20, %s29_s29  }
  0x42   : > { %p1107_p5 = por %p1239_p3, %p36_p13  ;;  %p38_p9 = por %p37_p10, %p36_p13 }
  0x43   : > { %s208_s30 = sand.u32 1, %s943_s20   ;;  %s614_s6 = sshll.u32 %s947_s21, 6 }
  0x44   : > { %s1240_s23 = scalar_select %p1107_p5, 1, 0 }
  0x45   : > { %s613_s7 = sshll.u32 %s208_s30, 2  ;;  %s1120_s8 = scalar_lea.hbm %s1226_s0, %s614_s6 }
  0x46   : > { %s212_s9 = scalar_lea.vmem [#allocation2], %s613_s7  ;;  %p1124_p11 = pnand %p729_p7, %p38_p9 }
  0x47   : > { %s219_s10 = sshll.u32 %s212_s9, 4  ;;  %s209_s28 = scalar_lea.sflag [#allocation3], %s208_s30  ;;  %s1122_s10 = int_to_ptr.vmem [resolvable:$true] %s219_s10 }
  0x48   : > { %s847_s12 = scalar_lea.hbm %s1120_s8, 64  ;;  %p849_p0 = pneg %p1124_p11 }
  0x49   : > { %p848_p12 = scmp.ne.s32.totalorder %s1120_s8, %s847_s12  ;;  %s852_s17 = scalar_lea.hbm %s1226_s0, 128 }
  0x4a   : > { %p853_p13 = scmp.lt.u32.totalorder %s1120_s8, %s1226_s0  ;;  %p854_p6 = scmp.lt.u32.totalorder %s852_s17, %s847_s12 }
  0x4b   : > { %p850_p2 = pnand %p849_p0, %p848_p12  ;;  %p856_p3 = scmp.lt.u32.totalorder %s847_s12, %s1120_s8 }
  0x4c   : > { %p855_p10 = por %p854_p6, %p853_p13 }
  0x4d   : > { %p851_p1 = pneg %p850_p2 }
  0x4e   : > { %p857_p7 = por %p856_p3, %p855_p10 }
  0x50   : > { %p858_p9 = pnand %p857_p7, %p851_p1 }
  0x52   : > { %861 = shalt.err (!%p858_p9)
}
  0x53   : > { %s862_s30 = scalar_lea.vmem %s1122_s10, 64  ;;  %s953_s15 = smov [#allocation2]  }
  0x54   : > { %p863_p12 = scmp.ne.s32.totalorder %s1122_s10, %s862_s30  ;;  %s867_s16 = sshll.u32 %s953_s15, 4  ;;  %s868_s16 = int_to_ptr.vmem [resolvable:$false] %s867_s16 }
  0x55   : > { %s869_s9 = scalar_lea.vmem %s868_s16, 128  ;;  %p870_p4 = scmp.lt.s32.totalorder %s1122_s10, %s868_s16 }
  0x56   : > { %p865_p2 = pnand %p863_p12, %p849_p0  ;;  %p871_p13 = scmp.lt.s32.totalorder %s869_s9, %s862_s30 }
  0x58   : > { %p866_p5 = pneg %p865_p2  ;;  %p872_p6 = por %p871_p13, %p870_p4 }
  0x5a   : > { %p873_p10 = pnand %p872_p6, %p866_p5 }
  0x5c   : > { %876 = shalt.err (!%p873_p10)
}
  0x5d   : > { %722 = dma.hbm_to_vmem [thread:$0]  (!%p1124_p11), %s1120_s8, 64, %s1122_s10, %s209_s28  }
  0x5e   : > { %228 = sbr.rel (%p1027_p8) target bundleno = 897 (0x381), region = 40  ;;  %s1156_s12 = sand.u32 (!%p1027_p8), 1, %s939_s19  }
  0x5f   : > { %s616_s13 = sshll.u32 (!%p1027_p8), %s1156_s12, 2  ;;  %s231_s29 = scalar_lea.sflag (!%p1027_p8), [#allocation3], %s1156_s12 }
  0x60   : > { %s1160_s17 = scalar_lea.vmem (!%p1027_p8), [#allocation2], %s616_s13  ;;  %p1242_p4 = scmp.ne.s32.totalorder (!%p1027_p8), %s1235_s24, 0 }
  0x65   : > { %922 = dma.done.wait (%p1242_p4), %s231_s29, 64  }
  0x66   : > { %924 = vsyncadd (%p1242_p4), %s231_s29, 4294967232  ;;  %p1243_p5 = scmp.eq.s32.totalorder %s1008_s22, 0 }
  0x68   : > { %926 = dma.done.wait (%p1243_p5), [#allocation6], 2048   ;;  %p1244_p8 = pmov %p1243_p5 }
  0x69   : > { %v954_v0 = vmov 0.0   ;;  %vm955_vm0 = vmmov 0   ;;  %v771_v1 = vld [vmem:[#allocation5] sm:$0xff]   ;;  %v772_v2 = vld [vmem:[#allocation5 + $0x8] sm:$0xff]   ;;  %v773_v3 = vld [vmem:[#allocation5 + $0x10] sm:$0xff]   ;;  %s619_s11 = sshll.u32 %s1156_s12, 3 }
  0x6a   : > { %928 = vsyncadd (%p1244_p8), [#allocation6], 4294965248  ;;  %660 = vmatprep.subr.bf16.mxu0 %v954_v0  ;;  %676 = vmatprep.mubr.msk.bf16.mxu0 %vm955_vm0, %v954_v0  ;;  %v779_v4 = vld [vmem:[#allocation7] sm:$0xff]   ;;  %v774_v5 = vld [vmem:[#allocation5 + $0x18] sm:$0xff]   ;;  %s639_s28 = sshll.u32 %s1008_s22, 7  ;;  %s268_s7 = scalar_lea.vmem [#allocation8], %s619_s11 }
  0x6b   : > { %680 = vmatprep.subr.bf16.mxu1 %v954_v0  ;;  %696 = vmatprep.mubr.msk.bf16.mxu1 %vm955_vm0, %v954_v0  ;;  %v780_v6 = vld [vmem:[#allocation7 + $0x8] sm:$0xff]   ;;  %v775_v7 = vld [vmem:[#allocation5 + $0x20] sm:$0xff]   ;;  %v781_v8 = vld [vmem:[#allocation7 + $0x10] sm:$0xff]   ;;  %s519_s6 = sshll.u32 %s268_s7, 4  ;;  %s1182_s16 = scalar_lea.hbm %s1231_s5, %s639_s28  ;;  %s1184_s6 = int_to_ptr.vmem [resolvable:$true] %s519_s6 }
  0x6c   : > { %661 = vmatpush3.bf16.msra.mxu0 %v771_v1  ;;  %681 = vmatpush3.bf16.msra.mxu1 %v779_v4  ;;  %v776_v9 = vld [vmem:[#allocation5 + $0x28] sm:$0xff]   ;;  %v782_v10 = vld [vmem:[#allocation7 + $0x18] sm:$0xff]   ;;  %v777_v11 = vld [vmem:[#allocation5 + $0x30] sm:$0xff]   ;;  %s506_s9 = scalar_lea.sflag [#allocation4], %s1156_s12  ;;  %s877_s13 = scalar_lea.vmem %s1184_s6, 128 }
  0x6d   : > { %662 = vmatprep.subr.bf16.mxu0 %v954_v0  ;;  %682 = vmatprep.subr.bf16.mxu1 %v954_v0  ;;  %v783_v12 = vld [vmem:[#allocation7 + $0x20] sm:$0xff]   ;;  %v778_v13 = vld [vmem:[#allocation5 + $0x38] sm:$0xff]   ;;  %v784_v14 = vld [vmem:[#allocation7 + $0x28] sm:$0xff]   ;;  %p878_p11 = scmp.ne.s32.totalorder %s1184_s6, %s877_s13  ;;  %p1245_p0 = scmp.ne.s32.totalorder %s1240_s23, 0 }
  0x6e   : > { %v270_v15 = vld [vmem:[%s1160_s17] sm:$0xf]  ;;  %v785_v16 = vld [vmem:[#allocation7 + $0x30] sm:$0xff]   ;;  %s956_s22 = smov [#allocation8]  }
  0x6f   : > { %v786_v17 = vld [vmem:[#allocation7 + $0x38] sm:$0xff]   ;;  %p879_p1 = pnand %p878_p11, %p1245_p0  ;;  %s881_s29 = sshll.u32 %s956_s22, 4  ;;  %s882_s29 = int_to_ptr.vmem [resolvable:$false] %s881_s29 }
  0x70   : > { %663 = vmatpush3.bf16.msra.mxu0 %v772_v2  ;;  %683 = vmatpush3.bf16.msra.mxu1 %v780_v6  ;;  %v620_v18 = vld [vmem:[%s1228_s2] ss:$0 sm:$0xff]  ;;  %s883_s17 = scalar_lea.vmem %s882_s29, 256  ;;  %p884_p7 = scmp.lt.s32.totalorder %s1184_s6, %s882_s29 }
  0x71   : > { %664 = vmatprep.subr.bf16.mxu0 %v954_v0  ;;  %684 = vmatprep.subr.bf16.mxu1 %v954_v0  ;;  %v629_v26 = vld [vmem:[%s1230_s4] ss:$0 sm:$0xff]  ;;  %p880_p3 = pneg %p879_p1  ;;  %p885_p9 = scmp.lt.s32.totalorder %s883_s17, %s877_s13 }
  0x73   : > { %p886_p12 = por %p885_p9, %p884_p7 }
  0x74   : > { %665 = vmatpush3.bf16.msra.mxu0 %v773_v3  ;;  %685 = vmatpush3.bf16.msra.mxu1 %v781_v8 }
  0x75   : > { %666 = vmatprep.subr.bf16.mxu0 %v954_v0  ;;  %686 = vmatprep.subr.bf16.mxu1 %v954_v0  ;;  %p887_p2 = pnand %p886_p12, %p880_p3 }
  0x78   : > { %667 = vmatpush3.bf16.msra.mxu0 %v774_v5  ;;  %687 = vmatpush3.bf16.msra.mxu1 %v782_v10 }
  0x79   : > { %668 = vmatprep.subr.bf16.mxu0 %v954_v0  ;;  %688 = vmatprep.subr.bf16.mxu1 %v954_v0 }
  0x7c   : > { %669 = vmatpush3.bf16.msra.mxu0 %v775_v7  ;;  %689 = vmatpush3.bf16.msra.mxu1 %v783_v12 }
  0x7d   : > { %670 = vmatprep.subr.bf16.mxu0 %v954_v0  ;;  %690 = vmatprep.subr.bf16.mxu1 %v954_v0 }
  0x80   : > { %671 = vmatpush3.bf16.msra.mxu0 %v776_v9  ;;  %691 = vmatpush3.bf16.msra.mxu1 %v784_v14 }
  0x81   : > { %672 = vmatprep.subr.bf16.mxu0 %v954_v0  ;;  %692 = vmatprep.subr.bf16.mxu1 %v954_v0 }
  0x84   : > { %673 = vmatpush3.bf16.msra.mxu0 %v777_v11  ;;  %693 = vmatpush3.bf16.msra.mxu1 %v785_v16 }
  0x85   : > { %674 = vmatprep.subr.bf16.mxu0 %v954_v0  ;;  %694 = vmatprep.subr.bf16.mxu1 %v954_v0 }
  0x88   : > { %675 = vmatpush3.bf16.msra.mxu0 %v778_v13  ;;  %695 = vmatpush3.bf16.msra.mxu1 %v786_v17 }
  0x8b   : > { %677 = vmatmul.mubr.bf16.vlgmr.msra.gmra.mrb[0].mxu0 %v270_v15 }
 0x15e   : > { %v376_v19 = vpop.f32.mrb[0].mxu0 }
 0x15f   : > { %v377_v20 = vadd.f32 %v620_v18, %v376_v19  ;;  %v678_v21 = vpop.f32.mrb[1].mxu0 }
 0x160   : > { %v379_v22 = vpop.f32.mrb[2].mxu0 }
 0x161   : > { %v382_v23 = vmax.f32 %v377_v20, 0.0  ;;  %v679_v24 = vpop.f32.mrb[3].mxu0 }
 0x163   : > { %v383_v25 = vpack.c.bf16 %v382_v23, %v382_v23 }
 0x165   : > { %697 = vmatmul.mubr.bf16.vlgmr.msra.gmra.mrb[0].mxu1 %v383_v25 }
 0x238   : > { %v489_v27 = vpop.f32.mrb[0].mxu1 }
 0x239   : > { %v490_v28 = vadd.f32 %v629_v26, %v489_v27  ;;  %v698_v29 = vpop.f32.mrb[1].mxu1 }
 0x23a   : > { %v492_v30 = vpop.f32.mrb[2].mxu1 }
 0x23b   : > { %495 = vmax.xlane.f32.xlu0 %v490_v28  ;;  %v699_v31 = vpop.f32.mrb[3].mxu1 }
 0x2c8   : > { %v496_v32 = vpop.xlane.xlu0 %495 }
 0x2c9   : > { %v497_v33 = vsub.f32 %v490_v28, %v496_v32 }
 0x2cb   : > { %v498_v34 = vmul.f32 1.442695, %v497_v33 }
 0x2cd   : > { %787 = vpow2.f32 %v498_v34 }
 0x2d7   : > { %v788_v35 = vpop.eup %787 }
 0x2d8   : > { %500 = vadd.xlane.f32.xlu0 %v788_v35 }
 0x365   : > { %v501_v36 = vpop.xlane.xlu0 %500 }
 0x366   : > { %789 = vrcp.f32 %v501_v36 }
 0x370   : > { %v790_v37 = vpop.eup %789 }
 0x371   : > { %v503_v38 = vmul.f32 %v790_v37, %v788_v35 }
 0x373   : > { %504 = vst [vmem:[%s268_s7] sm:$0xff] %v503_v38 }
 0x374   : > { %890 = shalt.err (!%p887_p2)
}
 0x375   : > { %s891_s12 = scalar_lea.hbm %s1182_s16, 128  ;;  %s895_s8 = scalar_lea.hbm %s1231_s5, 256 }
 0x376   : > { %p892_p13 = scmp.ne.s32.totalorder %s1182_s16, %s891_s12  ;;  %p896_p4 = scmp.lt.u32.totalorder %s1182_s16, %s1231_s5 }
 0x377   : > { %p897_p5 = scmp.lt.u32.totalorder %s895_s8, %s891_s12  ;;  %p899_p11 = scmp.lt.u32.totalorder %s891_s12, %s1182_s16 }
 0x378   : > { %p893_p6 = pnand %p892_p13, %p1245_p0 }
 0x379   : > { %p898_p8 = por %p897_p5, %p896_p4 }
 0x37a   : > { %p894_p10 = pneg %p893_p6 }
 0x37b   : > { %p900_p1 = por %p899_p11, %p898_p8 }
 0x37d   : > { %p901_p3 = pnand %p900_p1, %p894_p10 }
 0x37f   : > { %904 = shalt.err (!%p901_p3)
}
 0x380   : > { %710 = dma.vmem_to_hbm [thread:$0]  (%p1245_p0), %s1184_s6, 128, %s1182_s16, %s506_s9  }
 0x381 PF: > { %s531_s28 = sand.u32 1, %s935_s18   ;;  %p1246_p7 = scmp.ne.s32.totalorder %s1236_s25, 0 }
 0x382   : > { %p1247_p9 = scmp.ge.s32.totalorder %s947_s21, 2  ;;  %s532_s7 = scalar_lea.sflag [#allocation4], %s531_s28 }
 0x384   : > { %p724_p12 = pnand %p1247_p9, %p1246_p7 }
 0x386   : > { %930 = dma.done.wait (!%p724_p12), %s532_s7, 128  }
 0x387   : > { %932 = vsyncadd (!%p724_p12), %s532_s7, 4294967168  ;;  %p19_p2 = scmp.ge.s32.totalorder %s1097_s14, 4   ;;  %s1248_s18 = smov %s939_s19 }
 0x388   : > { %s1249_s19 = smov %s943_s20  ;;  %s1250_s20 = smov %s1113_s27 }
 0x389   : > { %s1251_s21 = smov %s1097_s14  ;;  %21 = sbr.rel (!%p19_p2) target bundleno = 6 (0x6), region = 93 }
 0x390   :  { %537 = vsyncpa [#allocation3], 1 }
 0x391   :  { %539 = vsyncpa [#allocation3 + $0x1], 1 }
 0x392   :  { %540 = vsyncpa [#allocation6], 1 }
 0x393   :  { %541 = vsyncpa [#allocation4], 1 }
 0x394   :  { %543 = vsyncpa [#allocation4 + $0x1], 1 }

</bundles_post_ra>
